<compile_context>
chip_gen: v7x
topology: tpu7x:2x2x1
jax: 0.10.0
libtpu: 0.0.40
codegen_flags: <defaults>
</compile_context>

<pallas_src>
import math

import jax
import jax.numpy as jnp
from jax.experimental import pallas as pl
from jax.experimental.pallas import tpu as pltpu


def _gelu_exact(x):
    # PyTorch nn.GELU() default = exact erf formulation.
    return 0.5 * x * (1.0 + jax.lax.erf(x * (1.0 / math.sqrt(2.0))))


def _round_up(n, m):
    return ((n + m - 1) // m) * m


def decoder_fc_kernel(z_ref, yc_ref, w1z_ref, w1c_ref, b1_ref,
                      w2_ref, b2_ref, w3_ref, b3_ref, o_ref):
    # z_ref  : (TM, latent)          yc_ref : (TM, num_classes)  one-hot / soft class labels
    # w1z_ref: (latent, H1)          w1c_ref: (num_classes, H1)
    # w2_ref : (H1, H2)              w3_ref : (H2, out_dim)      biases: (1, .)
    z = z_ref[...]
    h1 = jnp.dot(z, w1z_ref[...], preferred_element_type=jnp.float32)

    # Class contribution of the (conceptually concatenated) first Linear:
    #   concat(z, onehot) @ W1 == z @ W1_z + onehot @ W1_cls.
    # num_classes is tiny, so do it as an unrolled broadcast multiply-add on the VPU
    # instead of a K=num_classes MXU matmul.
    yc = yc_ref[...]
    w1c = w1c_ref[...]
    for c in range(yc_ref.shape[1]):
        h1 = h1 + yc[:, c:c + 1] * w1c[c:c + 1, :]

    h1 = _gelu_exact(h1 + b1_ref[...])
    h2 = _gelu_exact(jnp.dot(h1, w2_ref[...], preferred_element_type=jnp.float32) + b2_ref[...])
    h3 = jnp.dot(h2, w3_ref[...], preferred_element_type=jnp.float32) + b3_ref[...]
    # The PyTorch Sequential really ends with nn.GELU(), so the final activation is intentional.
    o_ref[...] = _gelu_exact(h3).astype(o_ref.dtype)


def decoder_fc_forward(z, y, params, *, njoints, nfeats, num_frames, num_classes,
                       block_rows=512):
    """Reproduces Decoder_FC.forward. Returns (bs, njoints, nfeats, num_frames)."""
    w1, b1, w2, b2, w3, b3 = params
    bs, latent_dim = z.shape
    h1_dim = w1.shape[1]
    h2_dim = w2.shape[1]
    out_dim = w3.shape[1]

    # Glue matching the PyTorch forward: integer labels -> one-hot, else cast to z.dtype.
    if y.ndim == 1:
        yc = jax.nn.one_hot(y, num_classes, dtype=z.dtype)
    else:
        yc = y.astype(z.dtype)

    # Split W1 so the concatenated (bs, latent+classes) activation never hits HBM.
    w1z = w1[:latent_dim]
    w1c = w1[latent_dim:]

    # Batch tiling.  Fast path: whole batch in one grid step (full-dim block -> no padding or
    # sublane rounding needed).  Large batches: TM rows per step (multiple of 8 f32 sublanes),
    # batch padded to a multiple of TM.  Weights are grid-invariant (constant index_map) ->
    # VMEM-resident; z / yc / out blocks are double-buffered by the Pallas pipeline.
    if bs <= block_rows:
        tm = bs
        bs_pad = bs
    else:
        tm = _round_up(block_rows, 8)
        bs_pad = _round_up(bs, tm)
        if bs_pad != bs:
            pad = bs_pad - bs
            z = jnp.pad(z, ((0, pad), (0, 0)))
            yc = jnp.pad(yc, ((0, pad), (0, 0)))

    grid = (bs_pad // tm,)

    flops = 2 * bs_pad * ((latent_dim + num_classes) * h1_dim
                          + h1_dim * h2_dim + h2_dim * out_dim)
    transcendentals = bs_pad * (h1_dim + h2_dim + out_dim)
    bytes_accessed = 4 * (bs_pad * (latent_dim + num_classes + out_dim)
                          + (latent_dim + num_classes) * h1_dim
                          + h1_dim * h2_dim + h2_dim * out_dim
                          + h1_dim + h2_dim + out_dim)

    def resident(shape):
        # Grid-invariant operand: constant index_map keeps it VMEM-resident across steps.
        return pl.BlockSpec(shape, lambda i: (0, 0))

    out = pl.pallas_call(
        decoder_fc_kernel,
        out_shape=jax.ShapeDtypeStruct((bs_pad, out_dim), z.dtype),
        grid=grid,
        in_specs=[
            pl.BlockSpec((tm, latent_dim), lambda i: (i, 0)),
            pl.BlockSpec((tm, num_classes), lambda i: (i, 0)),
            resident(w1z.shape),
            resident(w1c.shape),
            resident(b1.shape),
            resident(w2.shape),
            resident(b2.shape),
            resident(w3.shape),
            resident(b3.shape),
        ],
        out_specs=pl.BlockSpec((tm, out_dim), lambda i: (i, 0)),
        compiler_params=pltpu.CompilerParams(dimension_semantics=("parallel",)),
        cost_estimate=pl.CostEstimate(
            flops=int(flops),
            transcendentals=int(transcendentals),
            bytes_accessed=int(bytes_accessed)),
    )(z, yc, w1z, w1c, b1, w2, b2, w3, b3)

    # Glue: drop batch padding, reshape to the motion tensor layout.
    return out[:bs].reshape(bs, njoints, nfeats, num_frames)


def init_decoder_fc_params(key, input_dim, output_dim, dtype=jnp.float32):
    """Deterministic init matching nn.Linear shapes (weights stored as (in, out))."""
    dims = [(input_dim, 256), (256, 512), (512, output_dim)]
    params = []
    for din, dout in dims:
        kw, kb, key = jax.random.split(key, 3)
        bound = 1.0 / math.sqrt(din)
        w = jax.random.uniform(kw, (din, dout), dtype, minval=-bound, maxval=bound)
        b = jax.random.uniform(kb, (1, dout), dtype, minval=-bound, maxval=bound)
        params += [w, b]
    return tuple(params)


def _reference(z, y, params, num_classes, njoints, nfeats, num_frames):
    # Pure-JAX mirror of the PyTorch forward (one-hot + concat + 3x Linear/GELU + reshape).
    w1, b1, w2, b2, w3, b3 = params
    if y.ndim == 1:
        y = jax.nn.one_hot(y, num_classes, dtype=z.dtype)
    x = jnp.concatenate([z, y.astype(z.dtype)], axis=1)
    h = _gelu_exact(x @ w1 + b1)
    h = _gelu_exact(h @ w2 + b2)
    h = _gelu_exact(h @ w3 + b3)
    return h.reshape(z.shape[0], njoints, nfeats, num_frames)


if __name__ == "__main__":
    # Small, forward-consistent shapes.
    njoints = 6
    nfeats = 4
    num_frames = 8
    num_classes = 4
    latent_dim = 32

    input_dim = latent_dim + num_classes
    output_dim = njoints * nfeats * num_frames

    key = jax.random.PRNGKey(0)
    kz, ky, kp, kz2, ky2 = jax.random.split(key, 5)
    params = init_decoder_fc_params(kp, input_dim, output_dim)

    # Case 1: toy bs=2 (fast path: single grid step, no batch padding).
    bs = 2
    z = jax.random.normal(kz, (bs, latent_dim), dtype=jnp.float32)
    y = jax.random.randint(ky, (bs,), 0, num_classes, dtype=jnp.int32)
    out = decoder_fc_forward(
        z, y, params,
        njoints=njoints, nfeats=nfeats, num_frames=num_frames, num_classes=num_classes)
    out = jax.block_until_ready(out)
    ref = _reference(z, y, params, num_classes, njoints, nfeats, num_frames)
    assert out.shape == (bs, njoints, nfeats, num_frames)
    assert jnp.allclose(out, ref, atol=1e-5, rtol=1e-5), float(jnp.max(jnp.abs(out - ref)))

    # Case 2: multi-tile batch (exercises the grid, batch padding and resident weights).
    bs2 = 20
    z2 = jax.random.normal(kz2, (bs2, latent_dim), dtype=jnp.float32)
    y2 = jax.random.randint(ky2, (bs2,), 0, num_classes, dtype=jnp.int32)
    out2 = decoder_fc_forward(
        z2, y2, params,
        njoints=njoints, nfeats=nfeats, num_frames=num_frames, num_classes=num_classes,
        block_rows=8)
    out2 = jax.block_until_ready(out2)
    ref2 = _reference(z2, y2, params, num_classes, njoints, nfeats, num_frames)
    assert out2.shape == (bs2, njoints, nfeats, num_frames)
    assert jnp.allclose(out2, ref2, atol=1e-5, rtol=1e-5), float(jnp.max(jnp.abs(out2 - ref2)))

    print("KERNEL_OK")
</pallas_src>

<mosaic_0001>
module attributes {stable_mosaic.version = 11 : i64} {
  func.func @decoder_fc_kernel(%arg0: i32, %arg1: memref<2x32xf32, #tpu.memory_space<vmem>>, %arg2: memref<2x4xf32, #tpu.memory_space<vmem>>, %arg3: memref<32x256xf32, #tpu.memory_space<vmem>>, %arg4: memref<4x256xf32, #tpu.memory_space<vmem>>, %arg5: memref<1x256xf32, #tpu.memory_space<vmem>>, %arg6: memref<256x512xf32, #tpu.memory_space<vmem>>, %arg7: memref<1x512xf32, #tpu.memory_space<vmem>>, %arg8: memref<512x192xf32, #tpu.memory_space<vmem>>, %arg9: memref<1x192xf32, #tpu.memory_space<vmem>>, %arg10: memref<2x192xf32, #tpu.memory_space<vmem>>) attributes {dimension_semantics = [#tpu.dimension_semantics<parallel>], iteration_bounds = array<i64: 1>, scalar_prefetch = 0 : i64, scratch_operands = 0 : i64, tpu.core_type = #tpu.core_type<tc>, window_params = [{transform_indices = @transform_0, window_bounds = array<i64: 2, 32>}, {transform_indices = @transform_1, window_bounds = array<i64: 2, 4>}, {pipeline_mode = #tpu.pipeline_mode<synchronous>, transform_indices = @transform_2, window_bounds = array<i64: 32, 256>}, {pipeline_mode = #tpu.pipeline_mode<synchronous>, transform_indices = @transform_3, window_bounds = array<i64: 4, 256>}, {pipeline_mode = #tpu.pipeline_mode<synchronous>, transform_indices = @transform_4, window_bounds = array<i64: 1, 256>}, {pipeline_mode = #tpu.pipeline_mode<synchronous>, transform_indices = @transform_5, window_bounds = array<i64: 256, 512>}, {pipeline_mode = #tpu.pipeline_mode<synchronous>, transform_indices = @transform_6, window_bounds = array<i64: 1, 512>}, {pipeline_mode = #tpu.pipeline_mode<synchronous>, transform_indices = @transform_7, window_bounds = array<i64: 512, 192>}, {pipeline_mode = #tpu.pipeline_mode<synchronous>, transform_indices = @transform_8, window_bounds = array<i64: 1, 192>}, {transform_indices = @transform_9, window_bounds = array<i64: 2, 192>}]} {
    %c0 = arith.constant 0 : index
    %c0_0 = arith.constant 0 : index
    %0 = vector.load %arg1[%c0, %c0_0] : memref<2x32xf32, #tpu.memory_space<vmem>>, vector<2x32xf32>
    %c0_1 = arith.constant 0 : index
    %c0_2 = arith.constant 0 : index
    %1 = vector.load %arg3[%c0_1, %c0_2] : memref<32x256xf32, #tpu.memory_space<vmem>>, vector<32x256xf32>
    %cst = arith.constant dense<0.000000e+00> : vector<2x256xf32>
    %2 = tpu.matmul %0, %1, %cst {dimension_numbers = #tpu.dot_dimension_numbers<[1], [0], [0], [1], [0, 0, 1, 1], [], []>} : vector<2x32xf32>, vector<32x256xf32>, vector<2x256xf32> -> vector<2x256xf32>
    %c0_3 = arith.constant 0 : index
    %c0_4 = arith.constant 0 : index
    %3 = vector.load %arg2[%c0_3, %c0_4] : memref<2x4xf32, #tpu.memory_space<vmem>>, vector<2x4xf32>
    %c0_5 = arith.constant 0 : index
    %c0_6 = arith.constant 0 : index
    %4 = vector.load %arg4[%c0_5, %c0_6] : memref<4x256xf32, #tpu.memory_space<vmem>>, vector<4x256xf32>
    %5 = vector.extract_strided_slice %3 {offsets = [0, 0], sizes = [2, 1], strides = [1, 1]} : vector<2x4xf32> to vector<2x1xf32>
    %6 = vector.extract_strided_slice %4 {offsets = [0, 0], sizes = [1, 256], strides = [1, 1]} : vector<4x256xf32> to vector<1x256xf32>
    %7 = vector.broadcast %5 : vector<2x1xf32> to vector<2x256xf32>
    %8 = vector.broadcast %6 : vector<1x256xf32> to vector<2x256xf32>
    %9 = arith.mulf %7, %8 : vector<2x256xf32>
    %10 = arith.addf %2, %9 : vector<2x256xf32>
    %11 = vector.extract_strided_slice %3 {offsets = [0, 1], sizes = [2, 1], strides = [1, 1]} : vector<2x4xf32> to vector<2x1xf32>
    %12 = vector.extract_strided_slice %4 {offsets = [1, 0], sizes = [1, 256], strides = [1, 1]} : vector<4x256xf32> to vector<1x256xf32>
    %13 = vector.broadcast %11 : vector<2x1xf32> to vector<2x256xf32>
    %14 = vector.broadcast %12 : vector<1x256xf32> to vector<2x256xf32>
    %15 = arith.mulf %13, %14 : vector<2x256xf32>
    %16 = arith.addf %10, %15 : vector<2x256xf32>
    %17 = vector.extract_strided_slice %3 {offsets = [0, 2], sizes = [2, 1], strides = [1, 1]} : vector<2x4xf32> to vector<2x1xf32>
    %18 = vector.extract_strided_slice %4 {offsets = [2, 0], sizes = [1, 256], strides = [1, 1]} : vector<4x256xf32> to vector<1x256xf32>
    %19 = vector.broadcast %17 : vector<2x1xf32> to vector<2x256xf32>
    %20 = vector.broadcast %18 : vector<1x256xf32> to vector<2x256xf32>
    %21 = arith.mulf %19, %20 : vector<2x256xf32>
    %22 = arith.addf %16, %21 : vector<2x256xf32>
    %23 = vector.extract_strided_slice %3 {offsets = [0, 3], sizes = [2, 1], strides = [1, 1]} : vector<2x4xf32> to vector<2x1xf32>
    %24 = vector.extract_strided_slice %4 {offsets = [3, 0], sizes = [1, 256], strides = [1, 1]} : vector<4x256xf32> to vector<1x256xf32>
    %25 = vector.broadcast %23 : vector<2x1xf32> to vector<2x256xf32>
    %26 = vector.broadcast %24 : vector<1x256xf32> to vector<2x256xf32>
    %27 = arith.mulf %25, %26 : vector<2x256xf32>
    %28 = arith.addf %22, %27 : vector<2x256xf32>
    %c0_7 = arith.constant 0 : index
    %c0_8 = arith.constant 0 : index
    %29 = vector.load %arg5[%c0_7, %c0_8] : memref<1x256xf32, #tpu.memory_space<vmem>>, vector<1x256xf32>
    %30 = vector.broadcast %29 : vector<1x256xf32> to vector<2x256xf32>
    %31 = arith.addf %28, %30 : vector<2x256xf32>
    %cst_9 = arith.constant 5.000000e-01 : f32
    %32 = vector.broadcast %cst_9 : f32 to vector<2x256xf32>
    %33 = arith.mulf %32, %31 : vector<2x256xf32>
    %cst_10 = arith.constant 0.707106769 : f32
    %34 = vector.broadcast %cst_10 : f32 to vector<2x256xf32>
    %35 = arith.mulf %31, %34 : vector<2x256xf32>
    %36 = math.erf %35 : vector<2x256xf32>
    %cst_11 = arith.constant 1.000000e+00 : f32
    %37 = vector.broadcast %cst_11 : f32 to vector<2x256xf32>
    %38 = arith.addf %37, %36 : vector<2x256xf32>
    %39 = arith.mulf %33, %38 : vector<2x256xf32>
    %c0_12 = arith.constant 0 : index
    %c0_13 = arith.constant 0 : index
    %40 = vector.load %arg6[%c0_12, %c0_13] : memref<256x512xf32, #tpu.memory_space<vmem>>, vector<256x512xf32>
    %cst_14 = arith.constant dense<0.000000e+00> : vector<2x512xf32>
    %41 = tpu.matmul %39, %40, %cst_14 {dimension_numbers = #tpu.dot_dimension_numbers<[1], [0], [0], [1], [0, 0, 1, 1], [], []>} : vector<2x256xf32>, vector<256x512xf32>, vector<2x512xf32> -> vector<2x512xf32>
    %c0_15 = arith.constant 0 : index
    %c0_16 = arith.constant 0 : index
    %42 = vector.load %arg7[%c0_15, %c0_16] : memref<1x512xf32, #tpu.memory_space<vmem>>, vector<1x512xf32>
    %43 = vector.broadcast %42 : vector<1x512xf32> to vector<2x512xf32>
    %44 = arith.addf %41, %43 : vector<2x512xf32>
    %cst_17 = arith.constant 5.000000e-01 : f32
    %45 = vector.broadcast %cst_17 : f32 to vector<2x512xf32>
    %46 = arith.mulf %45, %44 : vector<2x512xf32>
    %cst_18 = arith.constant 0.707106769 : f32
    %47 = vector.broadcast %cst_18 : f32 to vector<2x512xf32>
    %48 = arith.mulf %44, %47 : vector<2x512xf32>
    %49 = math.erf %48 : vector<2x512xf32>
    %cst_19 = arith.constant 1.000000e+00 : f32
    %50 = vector.broadcast %cst_19 : f32 to vector<2x512xf32>
    %51 = arith.addf %50, %49 : vector<2x512xf32>
    %52 = arith.mulf %46, %51 : vector<2x512xf32>
    %c0_20 = arith.constant 0 : index
    %c0_21 = arith.constant 0 : index
    %53 = vector.load %arg8[%c0_20, %c0_21] : memref<512x192xf32, #tpu.memory_space<vmem>>, vector<512x192xf32>
    %cst_22 = arith.constant dense<0.000000e+00> : vector<2x192xf32>
    %54 = tpu.matmul %52, %53, %cst_22 {dimension_numbers = #tpu.dot_dimension_numbers<[1], [0], [0], [1], [0, 0, 1, 1], [], []>} : vector<2x512xf32>, vector<512x192xf32>, vector<2x192xf32> -> vector<2x192xf32>
    %c0_23 = arith.constant 0 : index
    %c0_24 = arith.constant 0 : index
    %55 = vector.load %arg9[%c0_23, %c0_24] : memref<1x192xf32, #tpu.memory_space<vmem>>, vector<1x192xf32>
    %56 = vector.broadcast %55 : vector<1x192xf32> to vector<2x192xf32>
    %57 = arith.addf %54, %56 : vector<2x192xf32>
    %cst_25 = arith.constant 5.000000e-01 : f32
    %58 = vector.broadcast %cst_25 : f32 to vector<2x192xf32>
    %59 = arith.mulf %58, %57 : vector<2x192xf32>
    %cst_26 = arith.constant 0.707106769 : f32
    %60 = vector.broadcast %cst_26 : f32 to vector<2x192xf32>
    %61 = arith.mulf %57, %60 : vector<2x192xf32>
    %62 = math.erf %61 : vector<2x192xf32>
    %cst_27 = arith.constant 1.000000e+00 : f32
    %63 = vector.broadcast %cst_27 : f32 to vector<2x192xf32>
    %64 = arith.addf %63, %62 : vector<2x192xf32>
    %65 = arith.mulf %59, %64 : vector<2x192xf32>
    %c0_28 = arith.constant 0 : index
    %c0_29 = arith.constant 0 : index
    %66 = vector.load %arg10[%c0_28, %c0_29] : memref<2x192xf32, #tpu.memory_space<vmem>>, vector<2x192xf32>
    tpu.vector_store %arg10[%c0_28, %c0_29], %65 {strides = array<i32>} : memref<2x192xf32, #tpu.memory_space<vmem>>, vector<2x192xf32>,
    return
  }
  func.func @transform_0(%arg0: i32) -> (i32, i32) {
    %c0_i32 = arith.constant 0 : i32
    %c0_i32_0 = arith.constant 0 : i32
    return %arg0, %c0_i32 : i32, i32
  }
  func.func @transform_1(%arg0: i32) -> (i32, i32) {
    %c0_i32 = arith.constant 0 : i32
    %c0_i32_0 = arith.constant 0 : i32
    return %arg0, %c0_i32 : i32, i32
  }
  func.func @transform_2(%arg0: i32) -> (i32, i32) {
    %c0_i32 = arith.constant 0 : i32
    %c0_i32_0 = arith.constant 0 : i32
    %c0_i32_1 = arith.constant 0 : i32
    return %c0_i32, %c0_i32_0 : i32, i32
  }
  func.func @transform_3(%arg0: i32) -> (i32, i32) {
    %c0_i32 = arith.constant 0 : i32
    %c0_i32_0 = arith.constant 0 : i32
    %c0_i32_1 = arith.constant 0 : i32
    return %c0_i32, %c0_i32_0 : i32, i32
  }
  func.func @transform_4(%arg0: i32) -> (i32, i32) {
    %c0_i32 = arith.constant 0 : i32
    %c0_i32_0 = arith.constant 0 : i32
    %c0_i32_1 = arith.constant 0 : i32
    return %c0_i32, %c0_i32_0 : i32, i32
  }
  func.func @transform_5(%arg0: i32) -> (i32, i32) {
    %c0_i32 = arith.constant 0 : i32
    %c0_i32_0 = arith.constant 0 : i32
    %c0_i32_1 = arith.constant 0 : i32
    return %c0_i32, %c0_i32_0 : i32, i32
  }
  func.func @transform_6(%arg0: i32) -> (i32, i32) {
    %c0_i32 = arith.constant 0 : i32
    %c0_i32_0 = arith.constant 0 : i32
    %c0_i32_1 = arith.constant 0 : i32
    return %c0_i32, %c0_i32_0 : i32, i32
  }
  func.func @transform_7(%arg0: i32) -> (i32, i32) {
    %c0_i32 = arith.constant 0 : i32
    %c0_i32_0 = arith.constant 0 : i32
    %c0_i32_1 = arith.constant 0 : i32
    return %c0_i32, %c0_i32_0 : i32, i32
  }
  func.func @transform_8(%arg0: i32) -> (i32, i32) {
    %c0_i32 = arith.constant 0 : i32
    %c0_i32_0 = arith.constant 0 : i32
    %c0_i32_1 = arith.constant 0 : i32
    return %c0_i32, %c0_i32_0 : i32, i32
  }
  func.func @transform_9(%arg0: i32) -> (i32, i32) {
    %c0_i32 = arith.constant 0 : i32
    %c0_i32_0 = arith.constant 0 : i32
    return %arg0, %c0_i32 : i32, i32
  }
}

</mosaic_0001>

<bundles_post_ra>
// kernel: tpu_custom_call.1
= control target key start
LH: loop header
LB: loop body
LE: loop exit
PB: predicated region body
PF: predicated region fallthrough
CT: control target
= control target key end

     0   :  { %v1201_v7 = vmov 0.0   ;;  %v1202_v8 = vmov 0   ;;  %v1203_v13 = vmov 2   ;;  %vm70_vm0 = vcmask 261120   ;;  %s2129_s0 = inlined_call_operand.vmem [shape: f32[2,32], index: 0, kind: input, shape index: {}]   ;;  %s2130_s1 = inlined_call_operand.vmem [shape: f32[2,4], index: 1, kind: input, shape index: {}]   ;;  %s2131_s2 = inlined_call_operand.vmem [shape: f32[32,256], index: 2, kind: input, shape index: {}]   ;;  %s2132_s3 = inlined_call_operand.vmem [shape: f32[4,256], index: 3, kind: input, shape index: {}]   ;;  %s2133_s4 = inlined_call_operand.vmem [shape: f32[1,256], index: 4, kind: input, shape index: {}]   ;;  %s2134_s5 = inlined_call_operand.vmem [shape: f32[256,512], index: 5, kind: input, shape index: {}]   ;;  %s2135_s6 = inlined_call_operand.vmem [shape: f32[1,512], index: 6, kind: input, shape index: {}]   ;;  %s2136_s7 = inlined_call_operand.vmem [shape: f32[512,192], index: 7, kind: input, shape index: {}]   ;;  %s2137_s8 = inlined_call_operand.vmem [shape: f32[1,192], index: 8, kind: input, shape index: {}]   ;;  %s2138_s9 = inlined_call_operand.hbm [shape: f32[2,192], index: 9, kind: output, shape index: {}]  }
   0x1   :  { %v35_v0 = vld [vmem:[%s2131_s2 + $0x8] sm:$0xff]  ;;  %v37_v1 = vld [vmem:[%s2131_s2 + $0x18] sm:$0xff]  ;;  %v34_v2 = vld [vmem:[%s2131_s2] sm:$0xff]  ;;  %138 = vmatprep.mubr.f32.mxu0 %v1201_v7  ;;  %1156 = vset.pattern.permute.xlu0 %v1202_v8  ;;  %v1204_v24 = vmov 1   ;;  %v1205_v26 = vmov 3  }
   0x2   :  { %v881_v3 = vpack.c.bf16 %v37_v1, %v35_v0  ;;  %v36_v4 = vld [vmem:[%s2131_s2 + $0x10] sm:$0xff]  ;;  %v39_v5 = vld [vmem:[%s2131_s2 + $0x28] sm:$0xff]  ;;  %v41_v6 = vld [vmem:[%s2131_s2 + $0x38] sm:$0xff]  ;;  %1158 = vset.pattern.permute.xlu1 %v1203_v13 }
   0x3   :  { %v883_v9 = vpack.c.bf16 %v36_v4, %v34_v2  ;;  %v885_v10 = vpack.c.bf16 %v41_v6, %v39_v5  ;;  %v38_v11 = vld [vmem:[%s2131_s2 + $0x20] sm:$0xff]  ;;  %v40_v12 = vld [vmem:[%s2131_s2 + $0x30] sm:$0xff]  ;;  %v248_v15 = vld [vmem:[%s2134_s5 + $0x8] sm:$0xff] }
   0x4   :  { %882 = vmatprep.subr.bf16.mxu0 %v881_v3  ;;  %v42_v14 = vld [vmem:[%s2130_s1] sm:$0x3]  ;;  %v252_v16 = vld [vmem:[%s2134_s5 + $0x28] sm:$0xff]  ;;  %v887_v17 = vpack.c.bf16 %v40_v12, %v38_v11 }
   0x5   :  { %884 = vmatpush1.bf16.msra.mxu0 %v883_v9  ;;  %46 = vperm.xlu0 %1156, %v42_v14   ;;  %v247_v18 = vld [vmem:[%s2134_s5] sm:$0xff]  ;;  %v889_v20 = vpack.c.bf16 %v252_v16, %v248_v15  ;;  %v256_v21 = vld [vmem:[%s2134_s5 + $0x48] sm:$0xff] }
   0x6   :  { %886 = vmatprep.subr.bf16.mxu0 %v885_v10  ;;  %172 = vperm.xlu1 %1158, %v42_v14   ;;  %v251_v19 = vld [vmem:[%s2134_s5 + $0x20] sm:$0xff]  ;;  %v260_v22 = vld [vmem:[%s2134_s5 + $0x68] sm:$0xff] }
   0x7   :  { %v33_v23 = vld [vmem:[%s2129_s0] sm:$0x3]  ;;  %v891_v25 = vpack.c.bf16 %v251_v19, %v247_v18  ;;  %v893_v27 = vpack.c.bf16 %v260_v22, %v256_v21  ;;  %v264_v30 = vld [vmem:[%s2134_s5 + $0x88] sm:$0xff] }
   0x8   :  { %v255_v28 = vld [vmem:[%s2134_s5 + $0x40] sm:$0xff]  ;;  %v268_v31 = vld [vmem:[%s2134_s5 + $0xa8] sm:$0xff] }
   0x9   :  { %888 = vmatpush1.bf16.msra.mxu0 %v887_v17  ;;  %1157 = vset.pattern.permute.xlu0 %v1204_v24  ;;  %v259_v29 = vld [vmem:[%s2134_s5 + $0x60] sm:$0xff]  ;;  %v897_v33 = vpack.c.bf16 %v268_v31, %v264_v30  ;;  %v272_v36 = vld [vmem:[%s2134_s5 + $0xc8] sm:$0xff] }
   0xa   :  { %146 = vperm.xlu0 %1157, %v42_v14   ;;  %1159 = vset.pattern.permute.xlu1 %v1205_v26  ;;  %v895_v32 = vpack.c.bf16 %v259_v29, %v255_v28  ;;  %v263_v34 = vld [vmem:[%s2134_s5 + $0x80] sm:$0xff]  ;;  %v276_v37 = vld [vmem:[%s2134_s5 + $0xe8] sm:$0xff] }
   0xb   :  { %198 = vperm.xlu1 %1159, %v42_v14   ;;  %890 = vmatprep.subr.bf16.mxu0 %v889_v20  ;;  %v267_v35 = vld [vmem:[%s2134_s5 + $0xa0] sm:$0xff] }
   0xc   :  { %880 = vmatmul.mubr.msk.f32.vlgmr.msra.gmra.mrb[0].mxu0 %vm70_vm0, %v33_v23 }
   0xd   :  { %892 = vmatpush1.bf16.msra.mxu0 %v891_v25 }
   0xe   :  { %894 = vmatprep.subr.bf16.mxu0 %v893_v27  ;;  %1160 = vset.pattern.permute.xlu0 %v1205_v26 }
   0xf   :  { %14 = vsyncpa [#allocation3], 0  ;;  %v899_v38 = vpack.c.bf16 %v267_v35, %v263_v34  ;;  %v901_v39 = vpack.c.bf16 %v276_v37, %v272_v36  ;;  %v271_v40 = vld [vmem:[%s2134_s5 + $0xc0] sm:$0xff]  ;;  %v280_v42 = vld [vmem:[%s2134_s5 + $0x108] sm:$0xff]  ;;  %vm862_vm1 = vcmask 1041408   ;;  %vm863_vm2 = vcmask 519170  }
  0x10   :  { %v275_v41 = vld [vmem:[%s2134_s5 + $0xe0] sm:$0xff]  ;;  %v284_v43 = vld [vmem:[%s2134_s5 + $0x128] sm:$0xff]  ;;  %vm864_vm3 = vmor %vm863_vm2, %vm862_vm1 }
  0x11   :  { %896 = vmatpush1.bf16.msra.mxu0 %v895_v32  ;;  %v903_v44 = vpack.c.bf16 %v275_v41, %v271_v40  ;;  %v905_v45 = vpack.c.bf16 %v284_v43, %v280_v42  ;;  %v279_v46 = vld [vmem:[%s2134_s5 + $0x100] sm:$0xff]  ;;  %v288_v48 = vld [vmem:[%s2134_s5 + $0x148] sm:$0xff] }
  0x12   :  { %898 = vmatprep.subr.bf16.mxu0 %v897_v33  ;;  %v283_v47 = vld [vmem:[%s2134_s5 + $0x120] sm:$0xff]  ;;  %v292_v49 = vld [vmem:[%s2134_s5 + $0x168] sm:$0xff] }
  0x13   :  { %v907_v50 = vpack.c.bf16 %v283_v47, %v279_v46  ;;  %v909_v51 = vpack.c.bf16 %v292_v49, %v288_v48  ;;  %v287_v52 = vld [vmem:[%s2134_s5 + $0x140] sm:$0xff]  ;;  %v296_v54 = vld [vmem:[%s2134_s5 + $0x188] sm:$0xff] }
  0x14   :  { %v291_v53 = vld [vmem:[%s2134_s5 + $0x160] sm:$0xff]  ;;  %v300_v55 = vld [vmem:[%s2134_s5 + $0x1a8] sm:$0xff] }
  0x15   :  { %900 = vmatpush1.bf16.msra.mxu0 %v899_v38  ;;  %v911_v56 = vpack.c.bf16 %v291_v53, %v287_v52  ;;  %v913_v57 = vpack.c.bf16 %v300_v55, %v296_v54  ;;  %v295_v58 = vld [vmem:[%s2134_s5 + $0x180] sm:$0xff]  ;;  %v304_v60 = vld [vmem:[%s2134_s5 + $0x1c8] sm:$0xff]  ;;  %v254_v52 = vld [vmem:[%s2134_s5 + $0x38] sm:$0xff] }
  0x16   :  { %902 = vmatprep.subr.bf16.mxu0 %v901_v39  ;;  %v299_v59 = vld [vmem:[%s2134_s5 + $0x1a0] sm:$0xff]  ;;  %v308_v61 = vld [vmem:[%s2134_s5 + $0x1e8] sm:$0xff]  ;;  %v562_v55 = vld [vmem:[%s2136_s7 + $0x18] sm:$0xff] }
  0x17   :  { %v915_v62 = vpack.c.bf16 %v299_v59, %v295_v58  ;;  %v917_v63 = vpack.c.bf16 %v308_v61, %v304_v60  ;;  %v303_v0 = vld [vmem:[%s2134_s5 + $0x1c0] sm:$0xff]  ;;  %v312_v2 = vld [vmem:[%s2134_s5 + $0x208] sm:$0xff]  ;;  %v561_v58 = vld [vmem:[%s2136_s7 + $0x10] sm:$0xff] }
  0x18   :  { %v307_v1 = vld [vmem:[%s2134_s5 + $0x1e0] sm:$0xff]  ;;  %v316_v3 = vld [vmem:[%s2134_s5 + $0x228] sm:$0xff]  ;;  %v566_v60 = vld [vmem:[%s2136_s7 + $0x38] sm:$0xff] }
  0x19   :  { %904 = vmatpush1.bf16.msra.mxu0 %v903_v44  ;;  %v919_v4 = vpack.c.bf16 %v307_v1, %v303_v0  ;;  %v921_v5 = vpack.c.bf16 %v316_v3, %v312_v2  ;;  %v311_v6 = vld [vmem:[%s2134_s5 + $0x200] sm:$0xff]  ;;  %v320_v9 = vld [vmem:[%s2134_s5 + $0x248] sm:$0xff]  ;;  %v565_v0 = vld [vmem:[%s2136_s7 + $0x30] sm:$0xff] }
  0x1a   :  { %906 = vmatprep.subr.bf16.mxu0 %v905_v45  ;;  %v315_v7 = vld [vmem:[%s2134_s5 + $0x220] sm:$0xff]  ;;  %v324_v10 = vld [vmem:[%s2134_s5 + $0x268] sm:$0xff]  ;;  %v570_v2 = vld [vmem:[%s2136_s7 + $0x58] sm:$0xff] }
  0x1b   :  { %v923_v8 = vpack.c.bf16 %v315_v7, %v311_v6  ;;  %v925_v11 = vpack.c.bf16 %v324_v10, %v320_v9  ;;  %v319_v12 = vld [vmem:[%s2134_s5 + $0x240] sm:$0xff]  ;;  %v328_v15 = vld [vmem:[%s2134_s5 + $0x288] sm:$0xff]  ;;  %v569_v6 = vld [vmem:[%s2136_s7 + $0x50] sm:$0xff] }
  0x1c   :  { %v323_v13 = vld [vmem:[%s2134_s5 + $0x260] sm:$0xff]  ;;  %v332_v16 = vld [vmem:[%s2134_s5 + $0x2a8] sm:$0xff] }
  0x1d   :  { %908 = vmatpush1.bf16.msra.mxu0 %v907_v50  ;;  %v927_v14 = vpack.c.bf16 %v323_v13, %v319_v12  ;;  %v929_v17 = vpack.c.bf16 %v332_v16, %v328_v15  ;;  %v327_v18 = vld [vmem:[%s2134_s5 + $0x280] sm:$0xff]  ;;  %v336_v21 = vld [vmem:[%s2134_s5 + $0x2c8] sm:$0xff]  ;;  %v573_v12 = vld [vmem:[%s2136_s7 + $0x70] sm:$0xff]  ;;  %v50_v16 = vlaneseq }
  0x1e   :  { %910 = vmatprep.subr.bf16.mxu0 %v909_v51  ;;  %v331_v19 = vld [vmem:[%s2134_s5 + $0x2a0] sm:$0xff]  ;;  %v340_v22 = vld [vmem:[%s2134_s5 + $0x2e8] sm:$0xff]  ;;  %v250_v51 = vld [vmem:[%s2134_s5 + $0x18] sm:$0xff] }
  0x1f   :  { %v931_v20 = vpack.c.bf16 %v331_v19, %v327_v18  ;;  %v933_v23 = vpack.c.bf16 %v340_v22, %v336_v21  ;;  %v335_v24 = vld [vmem:[%s2134_s5 + $0x2c0] sm:$0xff]  ;;  %v344_v27 = vld [vmem:[%s2134_s5 + $0x308] sm:$0xff]  ;;  %v953_v53 = vpack.c.bf16 %v254_v52, %v250_v51  ;;  %v577_v19 = vld [vmem:[%s2136_s7 + $0x90] sm:$0xff] }
  0x20   :  { %v339_v25 = vld [vmem:[%s2134_s5 + $0x2e0] sm:$0xff]  ;;  %v348_v28 = vld [vmem:[%s2134_s5 + $0x328] sm:$0xff]  ;;  %v582_v21 = vld [vmem:[%s2136_s7 + $0xb8] sm:$0xff] }
  0x21   :  { %912 = vmatpush1.bf16.msra.mxu0 %v911_v56  ;;  %v935_v26 = vpack.c.bf16 %v339_v25, %v335_v24  ;;  %v937_v29 = vpack.c.bf16 %v348_v28, %v344_v27  ;;  %v343_v30 = vld [vmem:[%s2134_s5 + $0x300] sm:$0xff]  ;;  %v352_v33 = vld [vmem:[%s2134_s5 + $0x348] sm:$0xff]  ;;  %v586_v28 = vld [vmem:[%s2136_s7 + $0xd8] sm:$0xff] }
  0x22   :  { %914 = vmatprep.subr.bf16.mxu0 %v913_v57  ;;  %v347_v31 = vld [vmem:[%s2134_s5 + $0x320] sm:$0xff]  ;;  %v356_v34 = vld [vmem:[%s2134_s5 + $0x368] sm:$0xff] }
  0x23   :  { %v939_v32 = vpack.c.bf16 %v347_v31, %v343_v30  ;;  %v351_v35 = vld [vmem:[%s2134_s5 + $0x340] sm:$0xff]  ;;  %v941_v36 = vpack.c.bf16 %v356_v34, %v352_v33  ;;  %v360_v38 = vld [vmem:[%s2134_s5 + $0x388] sm:$0xff]  ;;  %v585_v34 = vld [vmem:[%s2136_s7 + $0xd0] sm:$0xff] }
  0x24   :  { %v355_v37 = vld [vmem:[%s2134_s5 + $0x360] sm:$0xff]  ;;  %v364_v39 = vld [vmem:[%s2134_s5 + $0x3a8] sm:$0xff] }
  0x25   :  { %916 = vmatpush1.bf16.msra.mxu0 %v915_v62  ;;  %v943_v40 = vpack.c.bf16 %v355_v37, %v351_v35  ;;  %v945_v41 = vpack.c.bf16 %v364_v39, %v360_v38  ;;  %v359_v42 = vld [vmem:[%s2134_s5 + $0x380] sm:$0xff]  ;;  %v368_v44 = vld [vmem:[%s2134_s5 + $0x3c8] sm:$0xff]  ;;  %v590_v39 = vld [vmem:[%s2136_s7 + $0xf8] sm:$0xff] }
  0x26   :  { %918 = vmatprep.subr.bf16.mxu0 %v917_v63  ;;  %v363_v43 = vld [vmem:[%s2134_s5 + $0x3a0] sm:$0xff]  ;;  %v372_v45 = vld [vmem:[%s2134_s5 + $0x3e8] sm:$0xff] }
  0x27   :  { %v947_v46 = vpack.c.bf16 %v363_v43, %v359_v42  ;;  %v949_v47 = vpack.c.bf16 %v372_v45, %v368_v44  ;;  %v367_v48 = vld [vmem:[%s2134_s5 + $0x3c0] sm:$0xff]  ;;  %v560_v54 = vld [vmem:[%s2136_s7 + $0x8] sm:$0xff] }
  0x28   :  { %v371_v49 = vld [vmem:[%s2134_s5 + $0x3e0] sm:$0xff]  ;;  %v1017_v57 = vpack.c.bf16 %v562_v55, %v560_v54  ;;  %v564_v59 = vld [vmem:[%s2136_s7 + $0x28] sm:$0xff]  ;;  %v594_v54 = vld [vmem:[%s2136_s7 + $0x118] sm:$0xff] }
  0x29   :  { %920 = vmatpush1.bf16.msra.mxu0 %v919_v4  ;;  %v951_v50 = vpack.c.bf16 %v371_v49, %v367_v48  ;;  %v559_v56 = vld [vmem:[%s2136_s7] sm:$0xff]  ;;  %v1021_v62 = vpack.c.bf16 %v566_v60, %v564_v59  ;;  %v568_v1 = vld [vmem:[%s2136_s7 + $0x48] sm:$0xff]  ;;  %v589_v48 = vld [vmem:[%s2136_s7 + $0xf0] sm:$0xff] }
  0x2a   :  { %922 = vmatprep.subr.bf16.mxu0 %v921_v5  ;;  %v1019_v61 = vpack.c.bf16 %v561_v58, %v559_v56  ;;  %v563_v63 = vld [vmem:[%s2136_s7 + $0x20] sm:$0xff]  ;;  %1018 = vmatprep.subr.bf16.mxu1 %v1017_v57  ;;  %v1025_v4 = vpack.c.bf16 %v570_v2, %v568_v1  ;;  %v572_v7 = vld [vmem:[%s2136_s7 + $0x68] sm:$0xff] }
  0x2b   :  { %v1023_v3 = vpack.c.bf16 %v565_v0, %v563_v63  ;;  %v567_v5 = vld [vmem:[%s2136_s7 + $0x40] sm:$0xff]  ;;  %v576_v13 = vld [vmem:[%s2136_s7 + $0x88] sm:$0xff]  ;;  %v593_v63 = vld [vmem:[%s2136_s7 + $0x110] sm:$0xff] }
  0x2c   :  { %1020 = vmatpush1.bf16.msra.mxu1 %v1019_v61  ;;  %v1027_v9 = vpack.c.bf16 %v569_v6, %v567_v5  ;;  %v575_v18 = vld [vmem:[%s2136_s7 + $0x80] sm:$0xff]  ;;  %v584_v27 = vld [vmem:[%s2136_s7 + $0xc8] sm:$0xff]  ;;  %v598_v6 = vld [vmem:[%s2136_s7 + $0x138] sm:$0xff] }
  0x2d   :  { %924 = vmatpush1.bf16.msra.mxu0 %v923_v8  ;;  %1022 = vmatprep.subr.bf16.mxu1 %v1021_v62  ;;  %v574_v8 = vld [vmem:[%s2136_s7 + $0x78] sm:$0xff]  ;;  %v1035_v22 = vpack.c.bf16 %v577_v19, %v575_v18  ;;  %v579_v25 = vld [vmem:[%s2136_s7 + $0xa0] sm:$0xff]  ;;  %v588_v38 = vld [vmem:[%s2136_s7 + $0xe8] sm:$0xff] }
  0x2e   :  { %926 = vmatprep.subr.bf16.mxu0 %v925_v11  ;;  %v1029_v10 = vpack.c.bf16 %v574_v8, %v572_v7  ;;  %v571_v11 = vld [vmem:[%s2136_s7 + $0x60] sm:$0xff]  ;;  %v596_v5 = vld [vmem:[%s2136_s7 + $0x128] sm:$0xff] }
  0x2f   :  { %v1031_v15 = vpack.c.bf16 %v573_v12, %v571_v11  ;;  %v583_v33 = vld [vmem:[%s2136_s7 + $0xc0] sm:$0xff]  ;;  %v1053_v12 = vpack.c.bf16 %v598_v6, %v596_v5  ;;  %v266_v5 = vld [vmem:[%s2134_s5 + $0x98] sm:$0xff] }
  0x30   :  { %1024 = vmatpush1.bf16.msra.mxu1 %v1023_v3  ;;  %v43_v35 = vld [vmem:[%s2132_s3] sm:$0xff]  ;;  %v1043_v42 = vpack.c.bf16 %v585_v34, %v583_v33  ;;  %v270_v6 = vld [vmem:[%s2134_s5 + $0xb8] sm:$0xff] }
  0x31   :  { %928 = vmatpush1.bf16.msra.mxu0 %v927_v14  ;;  %1026 = vmatprep.subr.bf16.mxu1 %v1025_v4  ;;  %v578_v14 = vld [vmem:[%s2136_s7 + $0x98] sm:$0xff]  ;;  %v591_v62 = vld [vmem:[%s2136_s7 + $0x100] sm:$0xff] }
  0x32   :  { %930 = vmatprep.subr.bf16.mxu0 %v929_v17  ;;  %v1033_v17 = vpack.c.bf16 %v578_v14, %v576_v13  ;;  %v1051_v8 = vpack.c.bf16 %v593_v63, %v591_v62  ;;  %v595_v13 = vld [vmem:[%s2136_s7 + $0x120] sm:$0xff]  ;;  %v597_v14 = vld [vmem:[%s2136_s7 + $0x130] sm:$0xff] }
  0x34   :  { %1028 = vmatpush1.bf16.msra.mxu1 %v1027_v9 }
  0x35   :  { %932 = vmatpush1.bf16.msra.mxu0 %v931_v20  ;;  %1030 = vmatprep.subr.bf16.mxu1 %v1029_v10  ;;  %v580_v20 = vld [vmem:[%s2136_s7 + $0xa8] sm:$0xff] }
  0x36   :  { %934 = vmatprep.subr.bf16.mxu0 %v933_v23  ;;  %v1552_v23 = vshrl.u32 %v50_v16, 7  ;;  %v1037_v24 = vpack.c.bf16 %v582_v21, %v580_v20  ;;  %v600_v21 = vld [vmem:[%s2136_s7 + $0x148] sm:$0xff] }
  0x38   :  { %1032 = vmatpush1.bf16.msra.mxu1 %v1031_v15  ;;  %v1567_v30 = vsub.s32 0, %v1552_v23  ;;  %v1570_v31 = vsub.s32 1, %v1552_v23  ;;  %v155_v37 = vsub.s32 5, %v1552_v23  ;;  %v1595_v45 = vsub.s32 3, %v1552_v23 }
  0x39   :  { %936 = vmatpush1.bf16.msra.mxu0 %v935_v26  ;;  %1034 = vmatprep.subr.bf16.mxu1 %v1033_v17  ;;  %v581_v26 = vld [vmem:[%s2136_s7 + $0xb0] sm:$0xff]  ;;  %v207_v52 = vsub.s32 7, %v1552_v23 }
  0x3a   :  { %938 = vmatprep.subr.bf16.mxu0 %v937_v29  ;;  %v1039_v29 = vpack.c.bf16 %v581_v26, %v579_v25  ;;  %v53_v43 = vrot.slane %v43_v35, %v1567_v30  ;;  %v152_v44 = vrot.slane %v43_v35, %v1570_v31  ;;  %v156_v51 = vrot.slane %v43_v35, %v155_v37 }
  0x3b   :  { %v204_v60 = vrot.slane %v43_v35, %v1595_v45  ;;  %v208_v4 = vrot.slane %v43_v35, %v207_v52 }
  0x3c   :  { %1036 = vmatpush1.bf16.msra.mxu1 %v1035_v22  ;;  %v63_v58 = vrot.slane %v53_v43, %v1567_v30  ;;  %v162_v59 = vrot.slane %v152_v44, %v1570_v31  ;;  %v166_v2 = vrot.slane %v156_v51, %v1570_v31  ;;  %v602_v22 = vld [vmem:[%s2136_s7 + $0x158] sm:$0xff] }
  0x3d   :  { %940 = vmatpush1.bf16.msra.mxu0 %v939_v32  ;;  %1038 = vmatprep.subr.bf16.mxu1 %v1037_v24  ;;  %v1041_v32 = vpack.c.bf16 %v586_v28, %v584_v27  ;;  %v214_v11 = vrot.slane %v204_v60, %v1595_v45  ;;  %v218_v19 = vrot.slane %v208_v4, %v1595_v45  ;;  %v223_v27 = vld [vmem:[%s2133_s4] sm:$0x3]  ;;  %v258_v60 = vld [vmem:[%s2134_s5 + $0x58] sm:$0xff]  ;;  %v261_v4 = vld [vmem:[%s2134_s5 + $0x70] sm:$0xff] }
  0x3e   :  { %942 = vmatprep.subr.bf16.mxu0 %v941_v36  ;;  %v56_v36 = vsub.s32 4, %v1552_v23  ;;  %v1055_v28 = vpack.c.bf16 %v597_v14, %v595_v13  ;;  %v1057_v34 = vpack.c.bf16 %v602_v22, %v600_v21  ;;  %v232_v43 = vrot.slane %v223_v27, %v1570_v31  ;;  %v281_v21 = vld [vmem:[%s2134_s5 + $0x110] sm:$0xff] }
  0x3f   :  { %v285_v22 = vld [vmem:[%s2134_s5 + $0x130] sm:$0xff] }
  0x40   :  { %1040 = vmatpush1.bf16.msra.mxu1 %v1039_v29  ;;  %v57_v49 = vrot.slane %v43_v35, %v56_v36  ;;  %v601_v36 = vld [vmem:[%s2136_s7 + $0x150] sm:$0xff] }
  0x41   :  { %944 = vmatpush1.bf16.msra.mxu0 %v943_v40  ;;  %1042 = vmatprep.subr.bf16.mxu1 %v1041_v32 }
  0x42   :  { %946 = vmatprep.subr.bf16.mxu0 %v945_v41  ;;  %v1590_v41 = vsub.s32 2, %v1552_v23  ;;  %v67_v0 = vrot.slane %v57_v49, %v1567_v30 }
  0x44   :  { %v178_v55 = vrot.slane %v43_v35, %v1590_v41  ;;  %1044 = vmatpush1.bf16.msra.mxu1 %v1043_v42 }
  0x45   :  { %948 = vmatpush1.bf16.msra.mxu0 %v947_v46  ;;  %v1045_v46 = vpack.c.bf16 %v590_v39, %v588_v38 }
  0x46   :  { %950 = vmatprep.subr.bf16.mxu0 %v949_v47  ;;  %v587_v47 = vld [vmem:[%s2136_s7 + $0xe0] sm:$0xff]  ;;  %v188_v7 = vrot.slane %v178_v55, %v1590_v41 }
  0x47   :  { %v1047_v57 = vpack.c.bf16 %v589_v48, %v587_v47  ;;  %1046 = vmatprep.subr.bf16.mxu1 %v1045_v46 }
  0x49   :  { %952 = vmatpush1.bf16.msra.mxu0 %v951_v50  ;;  %v181_v50 = vsub.s32 6, %v1552_v23  ;;  %1048 = vmatpush1.bf16.msra.mxu1 %v1047_v57  ;;  %v253_v57 = vld [vmem:[%s2134_s5 + $0x30] sm:$0xff] }
  0x4a   :  { %954 = vmatprep.subr.bf16.mxu0 %v953_v53  ;;  %v592_v53 = vld [vmem:[%s2136_s7 + $0x108] sm:$0xff] }
  0x4b   :  { %v1049_v61 = vpack.c.bf16 %v594_v54, %v592_v53  ;;  %v182_v1 = vrot.slane %v43_v35, %v181_v50  ;;  %v599_v35 = vld [vmem:[%s2136_s7 + $0x140] sm:$0xff] }
  0x4c   :  { %v1059_v46 = vpack.c.bf16 %v601_v36, %v599_v35  ;;  %v297_v36 = vld [vmem:[%s2134_s5 + $0x190] sm:$0xff] }
  0x4d   :  { %1050 = vmatprep.subr.bf16.mxu1 %v1049_v61  ;;  %v192_v16 = vrot.slane %v182_v1, %v1590_v41  ;;  %v262_v61 = vld [vmem:[%s2134_s5 + $0x78] sm:$0xff] }
  0x4e   :  { %1052 = vmatpush1.bf16.msra.mxu1 %v1051_v8  ;;  %v961_v8 = vpack.c.bf16 %v270_v6, %v266_v5  ;;  %v337_v5 = vld [vmem:[%s2134_s5 + $0x2d0] sm:$0xff] }
  0x4f   :  { %1054 = vmatprep.subr.bf16.mxu1 %v1053_v12  ;;  %v278_v12 = vld [vmem:[%s2134_s5 + $0xf8] sm:$0xff]  ;;  %v341_v6 = vld [vmem:[%s2134_s5 + $0x2f0] sm:$0xff] }
  0x52   :  { %1056 = vmatpush1.bf16.msra.mxu1 %v1055_v28  ;;  %v289_v28 = vld [vmem:[%s2134_s5 + $0x150] sm:$0xff] }
  0x53   :  { %1058 = vmatprep.subr.bf16.mxu1 %v1057_v34 }
  0x56   :  { %1060 = vmatpush1.bf16.msra.mxu1 %v1059_v46  ;;  %v314_v46 = vld [vmem:[%s2134_s5 + $0x218] sm:$0xff] }
  0x84   :  { %v47_v40 = vpop.permute.xlu0 %46 }
  0x85   :  { %v173_v56 = vpop.permute.xlu1 %172  ;;  %v68_v9 = vmul.f32 %v63_v58, %v47_v40  ;;  %v69_v15 = vmul.f32 %v67_v0, %v47_v40  ;;  %v228_v40 = vrot.slane %v223_v27, %v1567_v30 }
  0x86   :  { %v193_v29 = vmul.f32 %v188_v7, %v173_v56  ;;  %v194_v37 = vmul.f32 %v192_v16, %v173_v56  ;;  %v249_v56 = vld [vmem:[%s2134_s5 + $0x10] sm:$0xff] }
  0x87   :  { %v955_v0 = vpack.c.bf16 %v253_v57, %v249_v56  ;;  %v277_v16 = vld [vmem:[%s2134_s5 + $0xf0] sm:$0xff] }
  0x88   :  { %v321_v56 = vld [vmem:[%s2134_s5 + $0x250] sm:$0xff] }
  0x89   :  { %v147_v3 = vpop.permute.xlu0 %146  ;;  %v325_v57 = vld [vmem:[%s2134_s5 + $0x270] sm:$0xff] }
  0x8a   :  { %v167_v10 = vmul.f32 %v162_v59, %v147_v3  ;;  %v168_v17 = vmul.f32 %v166_v2, %v147_v3  ;;  %v199_v20 = vpop.permute.xlu1 %198  ;;  %v957_v2 = vpack.c.bf16 %v262_v61, %v258_v60  ;;  %v257_v3 = vld [vmem:[%s2134_s5 + $0x50] sm:$0xff]  ;;  %v991_v60 = vpack.c.bf16 %v325_v57, %v321_v56  ;;  %v615_v57 = vld [vmem:[%s2136_s7 + $0x1c0] sm:$0xff] }
  0x8b   :  { %v219_v33 = vmul.f32 %v214_v11, %v199_v20  ;;  %v220_v39 = vmul.f32 %v218_v19, %v199_v20  ;;  %v959_v7 = vpack.c.bf16 %v261_v4, %v257_v3  ;;  %v274_v11 = vld [vmem:[%s2134_s5 + $0xd8] sm:$0xff] }
  0x8c   :  { %v965_v14 = vpack.c.bf16 %v278_v12, %v274_v11  ;;  %v345_v11 = vld [vmem:[%s2134_s5 + $0x310] sm:$0xff] }
  0x8d   :  { %v349_v12 = vld [vmem:[%s2134_s5 + $0x330] sm:$0xff] }
  0xdf   :  { %v140_v18 = vpop.f32.mrb[0].mxu0 }
  0xe0   :  { %v141_v24 = vadd.f32 %v140_v18, %v68_v9  ;;  %v142_v25 = vpop.f32.mrb[1].mxu0  ;;  %v265_v9 = vld [vmem:[%s2134_s5 + $0x90] sm:$0xff]  ;;  %v286_v18 = vld [vmem:[%s2134_s5 + $0x138] sm:$0xff] }
  0xe1   :  { %v143_v26 = vadd.f32 %v142_v25, %v69_v15  ;;  %v273_v15 = vld [vmem:[%s2134_s5 + $0xd0] sm:$0xff]  ;;  %v294_v25 = vld [vmem:[%s2134_s5 + $0x178] sm:$0xff] }
  0xe2   :  { %v169_v32 = vadd.f32 %v167_v10, %v141_v24  ;;  %v269_v10 = vld [vmem:[%s2134_s5 + $0xb0] sm:$0xff]  ;;  %v967_v19 = vpack.c.bf16 %v277_v16, %v273_v15  ;;  %v290_v24 = vld [vmem:[%s2134_s5 + $0x158] sm:$0xff]  ;;  %v1003_v15 = vpack.c.bf16 %v349_v12, %v345_v11 }
  0xe3   :  { %v170_v38 = vadd.f32 %v168_v17, %v143_v26  ;;  %v963_v13 = vpack.c.bf16 %v269_v10, %v265_v9  ;;  %v282_v17 = vld [vmem:[%s2134_s5 + $0x118] sm:$0xff]  ;;  %v971_v26 = vpack.c.bf16 %v285_v22, %v281_v21  ;;  %v973_v27 = vpack.c.bf16 %v294_v25, %v290_v24  ;;  %v361_v24 = vld [vmem:[%s2134_s5 + $0x390] sm:$0xff] }
  0xe4   :  { %v195_v42 = vadd.f32 %v193_v29, %v169_v32  ;;  %v969_v20 = vpack.c.bf16 %v286_v18, %v282_v17  ;;  %v293_v29 = vld [vmem:[%s2134_s5 + $0x170] sm:$0xff]  ;;  %v298_v32 = vld [vmem:[%s2134_s5 + $0x198] sm:$0xff]  ;;  %v999_v9 = vpack.c.bf16 %v341_v6, %v337_v5  ;;  %v1915_v6 = vld [vmem:[%s2135_s6] sm:$0xf] }
  0xe5   :  { %v196_v44 = vadd.f32 %v194_v37, %v170_v38  ;;  %v975_v34 = vpack.c.bf16 %v293_v29, %v289_v28  ;;  %v301_v37 = vld [vmem:[%s2134_s5 + $0x1b0] sm:$0xff]  ;;  %v306_v38 = vld [vmem:[%s2134_s5 + $0x1d8] sm:$0xff] }
  0xe6   :  { %v221_v47 = vadd.f32 %v219_v33, %v195_v42  ;;  %v302_v33 = vld [vmem:[%s2134_s5 + $0x1b8] sm:$0xff]  ;;  %v353_v17 = vld [vmem:[%s2134_s5 + $0x350] sm:$0xff] }
  0xe7   :  { %v222_v48 = vadd.f32 %v220_v39, %v196_v44  ;;  %v977_v35 = vpack.c.bf16 %v302_v33, %v298_v32  ;;  %v310_v39 = vld [vmem:[%s2134_s5 + $0x1f8] sm:$0xff]  ;;  %v309_v44 = vld [vmem:[%s2134_s5 + $0x1f0] sm:$0xff] }
  0xe8   :  { %v235_v49 = vadd.f32 %v228_v40, %v221_v47  ;;  %v979_v40 = vpack.c.bf16 %v301_v37, %v297_v36  ;;  %v981_v42 = vpack.c.bf16 %v310_v39, %v306_v38  ;;  %v318_v47 = vld [vmem:[%s2134_s5 + $0x238] sm:$0xff]  ;;  %v357_v18 = vld [vmem:[%s2134_s5 + $0x370] sm:$0xff]  ;;  %v603_v38 = vld [vmem:[%s2136_s7 + $0x160] sm:$0xff] }
  0xe9   :  { %v236_v50 = vadd.f32 %v232_v43, %v222_v48  ;;  %v305_v43 = vld [vmem:[%s2134_s5 + $0x1d0] sm:$0xff]  ;;  %v1007_v21 = vpack.c.bf16 %v357_v18, %v353_v17  ;;  %v606_v36 = vld [vmem:[%s2136_s7 + $0x178] sm:$0xff]  ;;  %v623_v18 = vld [vmem:[%s2136_s7 + $0x200] sm:$0xff] }
  0xea   :  { %v239_v51 = vmul.f32 0.70710677, %v235_v49  ;;  %v237_v62 = vmul.f32 0.5, %v235_v49  ;;  %v983_v48 = vpack.c.bf16 %v309_v44, %v305_v43  ;;  %v985_v49 = vpack.c.bf16 %v318_v47, %v314_v46  ;;  %v365_v25 = vld [vmem:[%s2134_s5 + $0x3b0] sm:$0xff]  ;;  %v607_v44 = vld [vmem:[%s2136_s7 + $0x180] sm:$0xff] }
  0xeb   :  { %v240_v52 = vmul.f32 0.70710677, %v236_v50  ;;  %v238_v58 = vmul.f32 0.5, %v236_v50  ;;  %v313_v50 = vld [vmem:[%s2134_s5 + $0x210] sm:$0xff]  ;;  %v1011_v28 = vpack.c.bf16 %v365_v25, %v361_v24  ;;  %v630_v24 = vld [vmem:[%s2136_s7 + $0x238] sm:$0xff] }
  0xec   :  { %1161 = verf.f32 %v239_v51  ;;  %v317_v51 = vld [vmem:[%s2134_s5 + $0x230] sm:$0xff] }
  0xed   :  { %1163 = verf.f32 %v240_v52  ;;  %v322_v52 = vld [vmem:[%s2134_s5 + $0x258] sm:$0xff]  ;;  %v369_v32 = vld [vmem:[%s2134_s5 + $0x3d0] sm:$0xff] }
  0xee   :  { %v373_v33 = vld [vmem:[%s2134_s5 + $0x3f0] sm:$0xff] }
  0xef   :  { %v605_v39 = vld [vmem:[%s2136_s7 + $0x170] sm:$0xff] }
  0xf0   :  { %v609_v46 = vld [vmem:[%s2136_s7 + $0x190] sm:$0xff] }
  0xf1   :  { %v1067_v47 = vpack.c.bf16 %v609_v46, %v607_v44  ;;  %v635_v44 = vld [vmem:[%s2136_s7 + $0x260] sm:$0xff]  ;;  %v637_v46 = vld [vmem:[%s2136_s7 + $0x270] sm:$0xff] }
  0xf6   :  { %v1162_v53 = vpop.eup %1161 }
  0xf7   :  { %v1164_v54 = vpop.eup %1163  ;;  %v243_v55 = vadd.f32 1.0, %v1162_v53  ;;  %v326_v53 = vld [vmem:[%s2134_s5 + $0x278] sm:$0xff] }
  0xf8   :  { %v244_v59 = vadd.f32 1.0, %v1164_v54  ;;  %v987_v54 = vpack.c.bf16 %v317_v51, %v313_v50  ;;  %v611_v51 = vld [vmem:[%s2136_s7 + $0x1a0] sm:$0xff] }
  0xf9   :  { %v1668_v1 = vmul.f32 %v243_v55, %v237_v62  ;;  %v989_v55 = vpack.c.bf16 %v326_v53, %v322_v52  ;;  %v329_v62 = vld [vmem:[%s2134_s5 + $0x290] sm:$0xff] }
  0xfa   :  { %v246_v63 = vmul.f32 %v244_v59, %v238_v58  ;;  %v330_v58 = vld [vmem:[%s2134_s5 + $0x298] sm:$0xff]  ;;  %v613_v52 = vld [vmem:[%s2136_s7 + $0x1b0] sm:$0xff] }
  0xfb   :  { %v334_v59 = vld [vmem:[%s2134_s5 + $0x2b8] sm:$0xff]  ;;  %v1071_v53 = vpack.c.bf16 %v613_v52, %v611_v51  ;;  %v639_v51 = vld [vmem:[%s2136_s7 + $0x280] sm:$0xff]  ;;  %v641_v52 = vld [vmem:[%s2136_s7 + $0x290] sm:$0xff] }
  0xfc   :  { %461 = vmatprep.mubr.f32.mxu0 %v246_v63  ;;  %v993_v61 = vpack.c.bf16 %v334_v59, %v330_v58  ;;  %v617_v58 = vld [vmem:[%s2136_s7 + $0x1d0] sm:$0xff] }
  0xfd   :  { %462 = vmatmul.mubr.f32.vlgmr.msra.gmra.mrb[2].mxu0 %v1668_v1  ;;  %v1075_v59 = vpack.c.bf16 %v617_v58, %v615_v57  ;;  %v643_v57 = vld [vmem:[%s2136_s7 + $0x2a0] sm:$0xff]  ;;  %v645_v58 = vld [vmem:[%s2136_s7 + $0x2b0] sm:$0xff] }
  0xfe   :  { %956 = vmatpush1.bf16.msra.mxu0 %v955_v0  ;;  %532 = vmatprep.mubr.f32.mxu0 %v246_v63  ;;  %v333_v63 = vld [vmem:[%s2134_s5 + $0x2b0] sm:$0xff]  ;;  %v338_v0 = vld [vmem:[%s2134_s5 + $0x2d8] sm:$0xff] }
  0xff   :  { %958 = vmatprep.subr.bf16.mxu0 %v957_v2  ;;  %v342_v2 = vld [vmem:[%s2134_s5 + $0x2f8] sm:$0xff]  ;;  %v995_v3 = vpack.c.bf16 %v333_v63, %v329_v62  ;;  %v619_v63 = vld [vmem:[%s2136_s7 + $0x1e0] sm:$0xff] }
 0x100   :  { %v997_v4 = vpack.c.bf16 %v342_v2, %v338_v0  ;;  %v621_v0 = vld [vmem:[%s2136_s7 + $0x1f0] sm:$0xff] }
 0x101   :  { %v1079_v2 = vpack.c.bf16 %v621_v0, %v619_v63  ;;  %v647_v63 = vld [vmem:[%s2136_s7 + $0x2c0] sm:$0xff]  ;;  %v649_v0 = vld [vmem:[%s2136_s7 + $0x2d0] sm:$0xff] }
 0x102   :  { %960 = vmatpush1.bf16.msra.mxu0 %v959_v7  ;;  %v346_v7 = vld [vmem:[%s2134_s5 + $0x318] sm:$0xff] }
 0x103   :  { %962 = vmatprep.subr.bf16.mxu0 %v961_v8  ;;  %v350_v8 = vld [vmem:[%s2134_s5 + $0x338] sm:$0xff] }
 0x104   :  { %v1001_v10 = vpack.c.bf16 %v350_v8, %v346_v7  ;;  %v380_v7 = vrot.slane %v1915_v6, %v1567_v30  ;;  %v384_v8 = vrot.slane %v1915_v6, %v1570_v31 }
 0x106   :  { %964 = vmatpush1.bf16.msra.mxu0 %v963_v13  ;;  %v354_v13 = vld [vmem:[%s2134_s5 + $0x358] sm:$0xff] }
 0x107   :  { %966 = vmatprep.subr.bf16.mxu0 %v965_v14  ;;  %v358_v14 = vld [vmem:[%s2134_s5 + $0x378] sm:$0xff] }
 0x108   :  { %v1005_v16 = vpack.c.bf16 %v358_v14, %v354_v13 }
 0x10a   :  { %968 = vmatpush1.bf16.msra.mxu0 %v967_v19  ;;  %v362_v19 = vld [vmem:[%s2134_s5 + $0x398] sm:$0xff] }
 0x10b   :  { %970 = vmatprep.subr.bf16.mxu0 %v969_v20  ;;  %v366_v20 = vld [vmem:[%s2134_s5 + $0x3b8] sm:$0xff] }
 0x10c   :  { %v1009_v22 = vpack.c.bf16 %v366_v20, %v362_v19  ;;  %v625_v19 = vld [vmem:[%s2136_s7 + $0x210] sm:$0xff] }
 0x10e   :  { %972 = vmatpush1.bf16.msra.mxu0 %v971_v26  ;;  %v370_v26 = vld [vmem:[%s2134_s5 + $0x3d8] sm:$0xff] }
 0x10f   :  { %974 = vmatprep.subr.bf16.mxu0 %v973_v27  ;;  %v374_v27 = vld [vmem:[%s2134_s5 + $0x3f8] sm:$0xff] }
 0x110   :  { %v1013_v29 = vpack.c.bf16 %v374_v27, %v370_v26  ;;  %v1083_v27 = vpack.c.bf16 %v625_v19, %v623_v18  ;;  %v659_v19 = vld [vmem:[%s2136_s7 + $0x320] sm:$0xff] }
 0x112   :  { %976 = vmatpush1.bf16.msra.mxu0 %v975_v34  ;;  %v1015_v34 = vpack.c.bf16 %v373_v33, %v369_v32  ;;  %v627_v32 = vld [vmem:[%s2136_s7 + $0x220] sm:$0xff]  ;;  %v629_v33 = vld [vmem:[%s2136_s7 + $0x230] sm:$0xff] }
 0x113   :  { %978 = vmatprep.subr.bf16.mxu0 %v977_v35  ;;  %v604_v35 = vld [vmem:[%s2136_s7 + $0x168] sm:$0xff] }
 0x114   :  { %v1061_v37 = vpack.c.bf16 %v606_v36, %v604_v35  ;;  %v634_v35 = vld [vmem:[%s2136_s7 + $0x258] sm:$0xff]  ;;  %v1087_v36 = vpack.c.bf16 %v629_v33, %v627_v32 }
 0x116   :  { %980 = vmatpush1.bf16.msra.mxu0 %v979_v40  ;;  %v1063_v40 = vpack.c.bf16 %v605_v39, %v603_v38  ;;  %1062 = vmatprep.subr.bf16.mxu1 %v1061_v37  ;;  %v631_v38 = vld [vmem:[%s2136_s7 + $0x240] sm:$0xff]  ;;  %v633_v39 = vld [vmem:[%s2136_s7 + $0x250] sm:$0xff] }
 0x117   :  { %982 = vmatprep.subr.bf16.mxu0 %v981_v42  ;;  %v610_v42 = vld [vmem:[%s2136_s7 + $0x198] sm:$0xff] }
 0x118   :  { %1064 = vmatpush1.bf16.msra.mxu1 %v1063_v40  ;;  %v636_v40 = vld [vmem:[%s2136_s7 + $0x268] sm:$0xff] }
 0x11a   :  { %984 = vmatpush1.bf16.msra.mxu0 %v983_v48  ;;  %v612_v48 = vld [vmem:[%s2136_s7 + $0x1a8] sm:$0xff] }
 0x11b   :  { %986 = vmatprep.subr.bf16.mxu0 %v985_v49  ;;  %v614_v49 = vld [vmem:[%s2136_s7 + $0x1b8] sm:$0xff] }
 0x11c   :  { %v1069_v50 = vpack.c.bf16 %v614_v49, %v612_v48  ;;  %v642_v48 = vld [vmem:[%s2136_s7 + $0x298] sm:$0xff]  ;;  %v1095_v49 = vpack.c.bf16 %v637_v46, %v635_v44 }
 0x11e   :  { %988 = vmatpush1.bf16.msra.mxu0 %v987_v54  ;;  %v616_v54 = vld [vmem:[%s2136_s7 + $0x1c8] sm:$0xff] }
 0x11f   :  { %990 = vmatprep.subr.bf16.mxu0 %v989_v55  ;;  %v618_v55 = vld [vmem:[%s2136_s7 + $0x1d8] sm:$0xff] }
 0x120   :  { %v1073_v56 = vpack.c.bf16 %v618_v55, %v616_v54  ;;  %v646_v54 = vld [vmem:[%s2136_s7 + $0x2b8] sm:$0xff]  ;;  %v1099_v55 = vpack.c.bf16 %v641_v52, %v639_v51  ;;  %v675_v52 = vld [vmem:[%s2136_s7 + $0x3a0] sm:$0xff] }
 0x122   :  { %992 = vmatpush1.bf16.msra.mxu0 %v991_v60  ;;  %v620_v60 = vld [vmem:[%s2136_s7 + $0x1e8] sm:$0xff] }
 0x123   :  { %994 = vmatprep.subr.bf16.mxu0 %v993_v61  ;;  %v622_v61 = vld [vmem:[%s2136_s7 + $0x1f8] sm:$0xff] }
 0x124   :  { %v1077_v62 = vpack.c.bf16 %v622_v61, %v620_v60  ;;  %v650_v60 = vld [vmem:[%s2136_s7 + $0x2d8] sm:$0xff]  ;;  %v1103_v61 = vpack.c.bf16 %v645_v58, %v643_v57  ;;  %v679_v58 = vld [vmem:[%s2136_s7 + $0x3c0] sm:$0xff] }
 0x126   :  { %996 = vmatpush1.bf16.msra.mxu0 %v995_v3  ;;  %v624_v3 = vld [vmem:[%s2136_s7 + $0x208] sm:$0xff] }
 0x127   :  { %998 = vmatprep.subr.bf16.mxu0 %v997_v4  ;;  %v626_v4 = vld [vmem:[%s2136_s7 + $0x218] sm:$0xff] }
 0x128   :  { %v1081_v5 = vpack.c.bf16 %v626_v4, %v624_v3  ;;  %v654_v3 = vld [vmem:[%s2136_s7 + $0x2f8] sm:$0xff]  ;;  %v1107_v4 = vpack.c.bf16 %v649_v0, %v647_v63  ;;  %v683_v0 = vld [vmem:[%s2136_s7 + $0x3e0] sm:$0xff] }
 0x12a   :  { %1000 = vmatpush1.bf16.msra.mxu0 %v999_v9 }
 0x12b   :  { %1002 = vmatprep.subr.bf16.mxu0 %v1001_v10 }
 0x12e   :  { %1004 = vmatpush1.bf16.msra.mxu0 %v1003_v15 }
 0x12f   :  { %1006 = vmatprep.subr.bf16.mxu0 %v1005_v16 }
 0x132   :  { %1008 = vmatpush1.bf16.msra.mxu0 %v1007_v21 }
 0x133   :  { %1010 = vmatprep.subr.bf16.mxu0 %v1009_v22  ;;  %v628_v22 = vld [vmem:[%s2136_s7 + $0x228] sm:$0xff] }
 0x136   :  { %1012 = vmatpush1.bf16.msra.mxu0 %v1011_v28 }
 0x137   :  { %1014 = vmatprep.subr.bf16.mxu0 %v1013_v29  ;;  %v1085_v29 = vpack.c.bf16 %v630_v24, %v628_v22  ;;  %v666_v22 = vld [vmem:[%s2136_s7 + $0x358] sm:$0xff] }
 0x13a   :  { %1016 = vmatpush1.bf16.msra.mxu0 %v1015_v34  ;;  %v632_v34 = vld [vmem:[%s2136_s7 + $0x248] sm:$0xff] }
 0x13b   :  { %v1089_v37 = vpack.c.bf16 %v634_v35, %v632_v34  ;;  %v667_v34 = vld [vmem:[%s2136_s7 + $0x360] sm:$0xff]  ;;  %v669_v35 = vld [vmem:[%s2136_s7 + $0x370] sm:$0xff] }
 0x13d   :  { %533 = vmatmul.mubr.f32.vlgmr.msra.gmra.mrb[4].mxu0 %v1668_v1  ;;  %v608_v1 = vld [vmem:[%s2136_s7 + $0x188] sm:$0xff] }
 0x13e   :  { %v1065_v43 = vpack.c.bf16 %v610_v42, %v608_v1  ;;  %v638_v1 = vld [vmem:[%s2136_s7 + $0x278] sm:$0xff]  ;;  %v1091_v42 = vpack.c.bf16 %v633_v39, %v631_v38  ;;  %v392_v39 = vrot.slane %v1915_v6, %v1595_v45 }
 0x13f   :  { %v674_v38 = vld [vmem:[%s2136_s7 + $0x398] sm:$0xff] }
 0x140   :  { %1066 = vmatprep.subr.bf16.mxu1 %v1065_v43  ;;  %v1093_v43 = vpack.c.bf16 %v638_v1, %v636_v40  ;;  %v1127_v40 = vpack.c.bf16 %v669_v35, %v667_v34  ;;  %v678_v45 = vld [vmem:[%s2136_s7 + $0x3b8] sm:$0xff] }
 0x141   :  { %1068 = vmatpush1.bf16.msra.mxu1 %v1067_v47  ;;  %v640_v47 = vld [vmem:[%s2136_s7 + $0x288] sm:$0xff] }
 0x142   :  { %1070 = vmatprep.subr.bf16.mxu1 %v1069_v50  ;;  %v1097_v50 = vpack.c.bf16 %v642_v48, %v640_v47  ;;  %v676_v47 = vld [vmem:[%s2136_s7 + $0x3a8] sm:$0xff] }
 0x143   :  { %v1133_v51 = vpack.c.bf16 %v678_v45, %v676_v47 }
 0x145   :  { %1072 = vmatpush1.bf16.msra.mxu1 %v1071_v53  ;;  %v644_v53 = vld [vmem:[%s2136_s7 + $0x2a8] sm:$0xff] }
 0x146   :  { %1074 = vmatprep.subr.bf16.mxu1 %v1073_v56  ;;  %v1101_v56 = vpack.c.bf16 %v646_v54, %v644_v53  ;;  %v677_v53 = vld [vmem:[%s2136_s7 + $0x3b0] sm:$0xff]  ;;  %v680_v54 = vld [vmem:[%s2136_s7 + $0x3c8] sm:$0xff] }
 0x149   :  { %1076 = vmatpush1.bf16.msra.mxu1 %v1075_v59  ;;  %v648_v59 = vld [vmem:[%s2136_s7 + $0x2c8] sm:$0xff] }
 0x14a   :  { %1078 = vmatprep.subr.bf16.mxu1 %v1077_v62  ;;  %v1105_v62 = vpack.c.bf16 %v650_v60, %v648_v59  ;;  %v681_v59 = vld [vmem:[%s2136_s7 + $0x3d0] sm:$0xff]  ;;  %v684_v60 = vld [vmem:[%s2136_s7 + $0x3e8] sm:$0xff] }
 0x14d   :  { %1080 = vmatpush1.bf16.msra.mxu1 %v1079_v2  ;;  %v652_v2 = vld [vmem:[%s2136_s7 + $0x2e8] sm:$0xff] }
 0x14e   :  { %1082 = vmatprep.subr.bf16.mxu1 %v1081_v5  ;;  %v1109_v5 = vpack.c.bf16 %v654_v3, %v652_v2  ;;  %v685_v2 = vld [vmem:[%s2136_s7 + $0x3f0] sm:$0xff] }
 0x1d0   :  { %v463_v9 = vpop.f32.mrb[2].mxu0 }
 0x1d1   :  { %v464_v10 = vadd.f32 %v463_v9, %v380_v7  ;;  %v465_v11 = vpop.f32.mrb[3].mxu0  ;;  %v651_v7 = vld [vmem:[%s2136_s7 + $0x2e0] sm:$0xff]  ;;  %v656_v9 = vld [vmem:[%s2136_s7 + $0x308] sm:$0xff] }
 0x1d2   :  { %v466_v12 = vadd.f32 %v465_v11, %v384_v8  ;;  %v653_v8 = vld [vmem:[%s2136_s7 + $0x2f0] sm:$0xff] }
 0x1d3   :  { %v543_v13 = vmul.f32 0.70710677, %v464_v10  ;;  %v539_v25 = vmul.f32 0.5, %v464_v10  ;;  %v658_v10 = vld [vmem:[%s2136_s7 + $0x318] sm:$0xff]  ;;  %v1111_v11 = vpack.c.bf16 %v653_v8, %v651_v7 }
 0x1d4   :  { %v544_v14 = vmul.f32 0.70710677, %v466_v12  ;;  %v540_v20 = vmul.f32 0.5, %v466_v12  ;;  %v1113_v12 = vpack.c.bf16 %v658_v10, %v656_v9 }
 0x1d5   :  { %1165 = verf.f32 %v543_v13  ;;  %v655_v13 = vld [vmem:[%s2136_s7 + $0x300] sm:$0xff] }
 0x1d6   :  { %1167 = verf.f32 %v544_v14  ;;  %v657_v14 = vld [vmem:[%s2136_s7 + $0x310] sm:$0xff] }
 0x1df   :  { %v1166_v15 = vpop.eup %1165 }
 0x1e0   :  { %v1168_v16 = vpop.eup %1167  ;;  %v551_v17 = vadd.f32 1.0, %v1166_v15  ;;  %v660_v15 = vld [vmem:[%s2136_s7 + $0x328] sm:$0xff] }
 0x1e1   :  { %v552_v21 = vadd.f32 1.0, %v1168_v16  ;;  %v662_v16 = vld [vmem:[%s2136_s7 + $0x338] sm:$0xff] }
 0x1e2   :  { %v555_v28 = vmul.f32 %v551_v17, %v539_v25  ;;  %v1115_v17 = vpack.c.bf16 %v657_v14, %v655_v13  ;;  %v1117_v18 = vpack.c.bf16 %v662_v16, %v660_v15  ;;  %v687_v13 = vld [vmem:[%s2137_s8] sm:$0x3] }
 0x1e3   :  { %v556_v26 = vmul.f32 %v552_v21, %v540_v20  ;;  %v661_v20 = vld [vmem:[%s2136_s7 + $0x330] sm:$0xff]  ;;  %v664_v21 = vld [vmem:[%s2136_s7 + $0x348] sm:$0xff]  ;;  %v692_v14 = vrot.slane %v687_v13, %v1567_v30  ;;  %v696_v15 = vrot.slane %v687_v13, %v1570_v31 }
 0x1e4   :  { %v1119_v24 = vpack.c.bf16 %v661_v20, %v659_v19  ;;  %v1121_v25 = vpack.c.bf16 %v666_v22, %v664_v21  ;;  %v1206_v22 = vmov 1983009808  }
 0x1e5   :  { %763 = vmatprep.mubr.f32.mxu1 %v556_v26  ;;  %v663_v26 = vld [vmem:[%s2136_s7 + $0x340] sm:$0xff] }
 0x1e6   :  { %764 = vmatmul.mubr.f32.vlgmr.msra.gmra.mrb[0].mxu1 %v555_v28  ;;  %v668_v28 = vld [vmem:[%s2136_s7 + $0x368] sm:$0xff] }
 0x1e7   :  { %1084 = vmatpush1.bf16.msra.mxu1 %v1083_v27  ;;  %v665_v27 = vld [vmem:[%s2136_s7 + $0x350] sm:$0xff] }
 0x1e8   :  { %1086 = vmatprep.subr.bf16.mxu1 %v1085_v29  ;;  %v670_v29 = vld [vmem:[%s2136_s7 + $0x378] sm:$0xff]  ;;  %v1123_v32 = vpack.c.bf16 %v665_v27, %v663_v26 }
 0x1e9   :  { %v1125_v33 = vpack.c.bf16 %v670_v29, %v668_v28 }
 0x1eb   :  { %1088 = vmatpush1.bf16.msra.mxu1 %v1087_v36  ;;  %v388_v36 = vrot.slane %v1915_v6, %v1590_v41  ;;  %v671_v41 = vld [vmem:[%s2136_s7 + $0x380] sm:$0xff] }
 0x1ec   :  { %1090 = vmatprep.subr.bf16.mxu1 %v1089_v37  ;;  %v672_v37 = vld [vmem:[%s2136_s7 + $0x388] sm:$0xff] }
 0x1ef   :  { %1092 = vmatpush1.bf16.msra.mxu1 %v1091_v42  ;;  %v1129_v42 = vpack.c.bf16 %v674_v38, %v672_v37 }
 0x1f0   :  { %1094 = vmatprep.subr.bf16.mxu1 %v1093_v43  ;;  %v673_v43 = vld [vmem:[%s2136_s7 + $0x390] sm:$0xff] }
 0x1f3   :  { %1096 = vmatpush1.bf16.msra.mxu1 %v1095_v49  ;;  %v1131_v49 = vpack.c.bf16 %v673_v43, %v671_v41 }
 0x1f4   :  { %1098 = vmatprep.subr.bf16.mxu1 %v1097_v50 }
 0x1f7   :  { %1100 = vmatpush1.bf16.msra.mxu1 %v1099_v55  ;;  %v682_v55 = vld [vmem:[%s2136_s7 + $0x3d8] sm:$0xff] }
 0x1f8   :  { %1102 = vmatprep.subr.bf16.mxu1 %v1101_v56  ;;  %v1135_v56 = vpack.c.bf16 %v677_v53, %v675_v52  ;;  %v1137_v57 = vpack.c.bf16 %v682_v55, %v680_v54 }
 0x1fb   :  { %1104 = vmatpush1.bf16.msra.mxu1 %v1103_v61  ;;  %v686_v61 = vld [vmem:[%s2136_s7 + $0x3f8] sm:$0xff]  ;;  %s1207_s7 = smov [#allocation2]  }
 0x1fc   :  { %1106 = vmatprep.subr.bf16.mxu1 %v1105_v62  ;;  %v1139_v62 = vpack.c.bf16 %v681_v59, %v679_v58  ;;  %v1141_v63 = vpack.c.bf16 %v686_v61, %v684_v60  ;;  %s872_s8 = sshll.u32 %s1207_s7, 4  ;;  %s873_s8 = int_to_ptr.vmem [resolvable:$true] %s872_s8 }
 0x1fd   :  { %s1177_s12 = scalar_lea.vmem %s873_s8, 64  ;;  %p1182_p1 = scmp.lt.s32.totalorder %s873_s8, %s873_s8 }
 0x1fe   :  { %p1178_p0 = scmp.ne.s32.totalorder %s873_s8, %s1177_s12  ;;  %p1183_p2 = scmp.lt.s32.totalorder %s1177_s12, %s1177_s12 }
 0x1ff   :  { %1108 = vmatpush1.bf16.msra.mxu1 %v1107_v4  ;;  %v1143_v4 = vpack.c.bf16 %v685_v2, %v683_v0 }
 0x200   :  { %1110 = vmatprep.subr.bf16.mxu1 %v1109_v5  ;;  %p1184_p3 = por %p1183_p2, %p1182_p1 }
 0x202   :  { %p1185_p4 = pnand %p1184_p3, %p1178_p0 }
 0x203   :  { %1112 = vmatpush1.bf16.msra.mxu1 %v1111_v11 }
 0x204   :  { %1114 = vmatprep.subr.bf16.mxu1 %v1113_v12 }
 0x207   :  { %1116 = vmatpush1.bf16.msra.mxu1 %v1115_v17 }
 0x208   :  { %1118 = vmatprep.subr.bf16.mxu1 %v1117_v18 }
 0x20b   :  { %1120 = vmatpush1.bf16.msra.mxu1 %v1119_v24  ;;  %v855_v24 = vunpack.c.l.s4 %v1206_v22 }
 0x20c   :  { %1122 = vmatprep.subr.bf16.mxu1 %v1121_v25 }
 0x20d   :  { %v856_v26 = vunpack.c.0.s8 %v855_v24 }
 0x20f   :  { %1124 = vmatpush1.bf16.msra.mxu1 %v1123_v32  ;;  %v859_v31 = vsub.s32 %v856_v26, %v1552_v23 }
 0x210   :  { %v534_v1 = vpop.f32.mrb[4].mxu0  ;;  %1126 = vmatprep.subr.bf16.mxu1 %v1125_v33 }
 0x211   :  { %v535_v44 = vadd.f32 %v534_v1, %v388_v36  ;;  %v536_v46 = vpop.f32.mrb[5].mxu0 }
 0x212   :  { %v537_v6 = vadd.f32 %v536_v46, %v392_v39 }
 0x213   :  { %v545_v48 = vmul.f32 0.70710677, %v535_v44  ;;  %1128 = vmatpush1.bf16.msra.mxu1 %v1127_v40  ;;  %v541_v10 = vmul.f32 0.5, %v535_v44 }
 0x214   :  { %v546_v50 = vmul.f32 0.70710677, %v537_v6  ;;  %1130 = vmatprep.subr.bf16.mxu1 %v1129_v42  ;;  %v542_v8 = vmul.f32 0.5, %v537_v6 }
 0x215   :  { %1169 = verf.f32 %v545_v48 }
 0x216   :  { %1171 = verf.f32 %v546_v50 }
 0x217   :  { %1132 = vmatpush1.bf16.msra.mxu1 %v1131_v49 }
 0x218   :  { %1134 = vmatprep.subr.bf16.mxu1 %v1133_v51 }
 0x21b   :  { %1136 = vmatpush1.bf16.msra.mxu1 %v1135_v56 }
 0x21c   :  { %1138 = vmatprep.subr.bf16.mxu1 %v1137_v57 }
 0x21f   :  { %v1170_v3 = vpop.eup %1169  ;;  %1140 = vmatpush1.bf16.msra.mxu1 %v1139_v62 }
 0x220   :  { %v1172_v5 = vpop.eup %1171  ;;  %v553_v7 = vadd.f32 1.0, %v1170_v3  ;;  %1142 = vmatprep.subr.bf16.mxu1 %v1141_v63 }
 0x221   :  { %v554_v9 = vadd.f32 1.0, %v1172_v5 }
 0x222   :  { %v557_v12 = vmul.f32 %v553_v7, %v541_v10 }
 0x223   :  { %1144 = vmatpush1.bf16.msra.mxu1 %v1143_v4  ;;  %v558_v11 = vmul.f32 %v554_v9, %v542_v8 }
 0x225   :  { %834 = vmatprep.mubr.f32.mxu1 %v558_v11 }
 0x226   :  { %835 = vmatmul.mubr.f32.vlgmr.msra.gmra.mrb[0].mxu1 %v557_v12 }
 0x2f9   :  { %v836_v16 = vpop.f32.mrb[0].mxu1 }
 0x2fa   :  { %v1145_v17 = vadd.f32 %v836_v16, %v692_v14  ;;  %v838_v18 = vpop.f32.mrb[1].mxu1 }
 0x2fb   :  { %v1146_v19 = vadd.f32 %v838_v18, %v696_v15 }
 0x2fc   :  { %v843_v20 = vmul.f32 0.70710677, %v1145_v17  ;;  %v841_v28 = vmul.f32 0.5, %v1145_v17 }
 0x2fd   :  { %v844_v21 = vmul.f32 0.70710677, %v1146_v19  ;;  %v842_v32 = vmul.f32 0.5, %v1146_v19 }
 0x2fe   :  { %1173 = verf.f32 %v843_v20 }
 0x2ff   :  { %1175 = verf.f32 %v844_v21 }
 0x308   :  { %v1174_v25 = vpop.eup %1173 }
 0x309   :  { %v1176_v27 = vpop.eup %1175  ;;  %v847_v29 = vadd.f32 1.0, %v1174_v25 }
 0x30a   :  { %v848_v33 = vadd.f32 1.0, %v1176_v27 }
 0x30b   :  { %v849_v30 = vmul.f32 %v847_v29, %v841_v28 }
 0x30c   :  { %v850_v34 = vmul.f32 %v848_v33, %v842_v32 }
 0x30e   :  { %v853_v35 = vcombine.low %v849_v30, %v850_v34 }
 0x310   :  { %v860_v36 = vrot.slane %v853_v35, %v859_v31 }
 0x312   :  { %865 = vst.msk [vmem:[#allocation2] sm:$0xf] %vm864_vm3, %v860_v36 }
 0x313   :  { %1188 = shalt.err (!%p1185_p4)
}
 0x314   :  { %s1189_s1 = scalar_lea.hbm %s2138_s9, 64 }
 0x315   :  { %p1190_p5 = scmp.ne.s32.totalorder %s2138_s9, %s1189_s1  ;;  %p1193_p6 = scmp.lt.u32.totalorder %s1189_s1, %s2138_s9 }
 0x317   :  { %p1195_p7 = pnand %p1193_p6, %p1190_p5 }
 0x319   :  { %1198 = shalt.err (!%p1195_p7)
}
 0x31a   :  { %875 = dma.vmem_to_hbm [thread:$0]  %s873_s8, 64, %s2138_s9, [#allocation3]  }
 0x31b   :  { %1199 = dma.done.wait [#allocation3], 64  }
 0x31c   :  { %1200 = vsyncadd [#allocation3], 4294967232 }
 0x31d   :  { %879 = vsyncpa [#allocation3], 1 }

</bundles_post_ra>
